<compile_context>
chip_gen: v6e
topology: v6e:2x2x1
jax: 0.10.0
libtpu: 0.0.40
codegen_flags: <defaults>
</compile_context>

<pallas_src>
import jax
import jax.numpy as jnp
from jax.experimental import pallas as pl
from jax.experimental.pallas import tpu as pltpu


def _transition_kernel(x_ref, scale_ref, shift_ref, w_ref, o_ref):
    # x_ref:     (4, TM, Cin)   four 2x2-window elements stacked on axis 0
    # scale_ref: (1, Cin)       folded BN scale (f32)
    # shift_ref: (1, Cin)       folded BN shift (f32)
    # w_ref:     (Cin, Cout_pad) 1x1 conv weight, bf16
    # o_ref:     (TM, Cout_pad)
    scale = scale_ref[...][None]            # (1, 1, Cin)
    shift = shift_ref[...][None]            # (1, 1, Cin)

    # BatchNorm (eval) + ReLU in f32 on the VPU (v5e-safe).
    x = x_ref[...].astype(jnp.float32)      # (4, TM, Cin)
    v = jnp.maximum(x * scale + shift, 0.0)

    # 2x2 average pool: plain vreg adds over the leading window axis.
    pooled = (v[0] + v[1] + v[2] + v[3]) * 0.25            # (TM, Cin) f32

    # 1x1 conv == channel matmul on the MXU, bf16 inputs / f32 accumulate.
    y = jnp.dot(pooled.astype(jnp.bfloat16), w_ref[...],
                preferred_element_type=jnp.float32)        # (TM, Cout_pad)

    o_ref[...] = y.astype(o_ref.dtype)


def transition_forward(x_nchw, gamma, beta, running_mean, running_var, conv_w,
                       eps=1e-5):
    """Forward of _Transition. x_nchw: (N, Cin, H, W). conv_w: (Cout, Cin, 1, 1)."""
    N, Cin, H, W = x_nchw.shape
    Cout = conv_w.shape[0]
    assert H % 2 == 0 and W % 2 == 0
    Hp, Wp = H // 2, W // 2
    M = N * Hp * Wp

    # ---- glue: NCHW -> (4, M, Cin); axis 0 = the four 2x2-window positions ----
    x = x_nchw.reshape(N, Cin, Hp, 2, Wp, 2)
    x = jnp.transpose(x, (3, 5, 0, 2, 4, 1)).reshape(4, M, Cin)

    # Fold BatchNorm (eval mode) into per-channel scale/shift (f32).
    scale = (gamma / jnp.sqrt(running_var + eps)).astype(jnp.float32)
    shift = (beta.astype(jnp.float32) - running_mean.astype(jnp.float32) * scale)
    scale = scale.reshape(1, Cin)
    shift = shift.reshape(1, Cin)

    # Lane-dense output: pad Cout up to a multiple of 128, slice after.
    cout_pad = ((Cout + 127) // 128) * 128
    w = jnp.transpose(conv_w.reshape(Cout, Cin), (1, 0)).astype(jnp.bfloat16)
    if cout_pad != Cout:
        w = jnp.pad(w, ((0, 0), (0, cout_pad - Cout)))      # (Cin, Cout_pad)

    # Row-tile size: largest candidate that keeps double-buffered VMEM modest
    # (portable to v7x's 64 MiB VMEM).
    x_bytes = jnp.dtype(x.dtype).itemsize
    out_bytes = jnp.dtype(x_nchw.dtype).itemsize
    budget = 24 * 1024 * 1024
    tm = 8
    for cand in (1024, 512, 256, 128, 64, 32, 16, 8):
        need = (4 * cand * Cin * x_bytes) * 2          # input block, 2 buffers
        need += (cand * cout_pad * out_bytes) * 2      # output block, 2 buffers
        need += (Cin * cout_pad * 2) * 2               # bf16 weight
        need += 4 * cand * Cin * 4                     # f32 temporaries
        if need <= budget:
            tm = cand
            break
    if M <= tm:
        tm = M
    grid = (pl.cdiv(M, tm),)

    out = pl.pallas_call(
        _transition_kernel,
        out_shape=jax.ShapeDtypeStruct((M, cout_pad), x_nchw.dtype),
        grid_spec=pltpu.PrefetchScalarGridSpec(
            num_scalar_prefetch=0,
            grid=grid,
            in_specs=[
                pl.BlockSpec((4, tm, Cin), lambda i: (0, i, 0)),
                pl.BlockSpec((1, Cin), lambda i: (0, 0)),
                pl.BlockSpec((1, Cin), lambda i: (0, 0)),
                pl.BlockSpec((Cin, cout_pad), lambda i: (0, 0)),
            ],
            out_specs=pl.BlockSpec((tm, cout_pad), lambda i: (i, 0)),
        ),
        compiler_params=pltpu.CompilerParams(
            dimension_semantics=("parallel",),
            vmem_limit_bytes=48 * 1024 * 1024),
    )(x, scale, shift, w)

    out = out[:, :Cout]                                     # drop lane padding
    out = out.reshape(N, Hp, Wp, Cout)
    return jnp.transpose(out, (0, 3, 1, 2))                 # back to NCHW


def _reference(x_nchw, gamma, beta, running_mean, running_var, conv_w, eps=1e-5):
    """Plain-JAX f32 reference matching PyTorch eval-mode semantics."""
    scale = (gamma / jnp.sqrt(running_var + eps)).reshape(1, -1, 1, 1)
    shift = (beta - running_mean * gamma / jnp.sqrt(running_var + eps)).reshape(1, -1, 1, 1)
    z = jnp.maximum(x_nchw * scale + shift, 0.0)             # BN + ReLU
    w = conv_w.reshape(conv_w.shape[0], conv_w.shape[1])     # (Cout, Cin)
    y = jnp.einsum("ncHW,oc->noHW", z, w)                    # 1x1 conv, no bias
    N, Co, H, W = y.shape
    y = y.reshape(N, Co, H // 2, 2, W // 2, 2).mean(axis=(3, 5))  # AvgPool2d(2,2)
    return y


if __name__ == "__main__":
    key = jax.random.PRNGKey(0)
    k1, k2, k3, k4, k5, k6 = jax.random.split(key, 6)

    N, Cin, H, W = 2, 4, 16, 16
    Cout = 2

    x = jax.random.normal(k1, (N, Cin, H, W), dtype=jnp.float32)

    # Deterministic synthetic parameters (shapes from __init__).
    gamma = 1.0 + 0.1 * jax.random.normal(k2, (Cin,), dtype=jnp.float32)
    beta = 0.1 * jax.random.normal(k3, (Cin,), dtype=jnp.float32)
    running_mean = 0.1 * jax.random.normal(k4, (Cin,), dtype=jnp.float32)
    running_var = jnp.abs(jax.random.normal(k5, (Cin,), dtype=jnp.float32)) + 0.5
    conv_w = 0.2 * jax.random.normal(k6, (Cout, Cin, 1, 1), dtype=jnp.float32)

    out = transition_forward(x, gamma, beta, running_mean, running_var, conv_w)
    out = jax.block_until_ready(out)

    ref = _reference(x, gamma, beta, running_mean, running_var, conv_w)
    assert out.shape == (N, Cout, H // 2, W // 2), out.shape
    # Tolerance accounts for the deliberate bf16 MXU matmul inputs
    # (f32 accumulation); error stays ~1e-3 absolute at these magnitudes.
    assert jnp.allclose(out, ref, atol=2e-2, rtol=2e-2), \
        float(jnp.max(jnp.abs(out - ref)))

    print("KERNEL_OK")
</pallas_src>

<mosaic_0001>
module attributes {stable_mosaic.version = 11 : i64} {
  func.func @_transition_kernel(%arg0: i32, %arg1: memref<4x128x4xf32, #tpu.memory_space<vmem>>, %arg2: memref<1x4xf32, #tpu.memory_space<vmem>>, %arg3: memref<1x4xf32, #tpu.memory_space<vmem>>, %arg4: memref<4x128xbf16, #tpu.memory_space<vmem>>, %arg5: memref<128x128xf32, #tpu.memory_space<vmem>>) attributes {dimension_semantics = [#tpu.dimension_semantics<parallel>], iteration_bounds = array<i64: 1>, scalar_prefetch = 0 : i64, scratch_operands = 0 : i64, tpu.core_type = #tpu.core_type<tc>, window_params = [{transform_indices = @transform_0, window_bounds = array<i64: 4, 128, 4>}, {pipeline_mode = #tpu.pipeline_mode<synchronous>, transform_indices = @transform_1, window_bounds = array<i64: 1, 4>}, {pipeline_mode = #tpu.pipeline_mode<synchronous>, transform_indices = @transform_2, window_bounds = array<i64: 1, 4>}, {pipeline_mode = #tpu.pipeline_mode<synchronous>, transform_indices = @transform_3, window_bounds = array<i64: 4, 128>}, {transform_indices = @transform_4, window_bounds = array<i64: 128, 128>}]} {
    %c0 = arith.constant 0 : index
    %c0_0 = arith.constant 0 : index
    %0 = vector.load %arg2[%c0, %c0_0] : memref<1x4xf32, #tpu.memory_space<vmem>>, vector<1x4xf32>
    %1 = vector.shape_cast %0 : vector<1x4xf32> to vector<1x1x4xf32>
    %c0_1 = arith.constant 0 : index
    %c0_2 = arith.constant 0 : index
    %2 = vector.load %arg3[%c0_1, %c0_2] : memref<1x4xf32, #tpu.memory_space<vmem>>, vector<1x4xf32>
    %3 = vector.shape_cast %2 : vector<1x4xf32> to vector<1x1x4xf32>
    %c0_3 = arith.constant 0 : index
    %c0_4 = arith.constant 0 : index
    %c0_5 = arith.constant 0 : index
    %4 = vector.load %arg1[%c0_3, %c0_4, %c0_5] : memref<4x128x4xf32, #tpu.memory_space<vmem>>, vector<4x128x4xf32>
    %5 = vector.broadcast %1 : vector<1x1x4xf32> to vector<4x128x4xf32>
    %6 = arith.mulf %4, %5 : vector<4x128x4xf32>
    %7 = vector.broadcast %3 : vector<1x1x4xf32> to vector<4x128x4xf32>
    %8 = arith.addf %6, %7 : vector<4x128x4xf32>
    %cst = arith.constant 0.000000e+00 : f32
    %9 = vector.broadcast %cst : f32 to vector<4x128x4xf32>
    %10 = arith.maximumf %8, %9 : vector<4x128x4xf32>
    %11 = vector.extract_strided_slice %10 {offsets = [0, 0, 0], sizes = [1, 128, 4], strides = [1, 1, 1]} : vector<4x128x4xf32> to vector<1x128x4xf32>
    %12 = vector.shape_cast %11 : vector<1x128x4xf32> to vector<128x4xf32>
    %13 = vector.extract_strided_slice %10 {offsets = [1, 0, 0], sizes = [1, 128, 4], strides = [1, 1, 1]} : vector<4x128x4xf32> to vector<1x128x4xf32>
    %14 = vector.shape_cast %13 : vector<1x128x4xf32> to vector<128x4xf32>
    %15 = arith.addf %12, %14 : vector<128x4xf32>
    %16 = vector.extract_strided_slice %10 {offsets = [2, 0, 0], sizes = [1, 128, 4], strides = [1, 1, 1]} : vector<4x128x4xf32> to vector<1x128x4xf32>
    %17 = vector.shape_cast %16 : vector<1x128x4xf32> to vector<128x4xf32>
    %18 = arith.addf %15, %17 : vector<128x4xf32>
    %19 = vector.extract_strided_slice %10 {offsets = [3, 0, 0], sizes = [1, 128, 4], strides = [1, 1, 1]} : vector<4x128x4xf32> to vector<1x128x4xf32>
    %20 = vector.shape_cast %19 : vector<1x128x4xf32> to vector<128x4xf32>
    %21 = arith.addf %18, %20 : vector<128x4xf32>
    %cst_6 = arith.constant 2.500000e-01 : f32
    %22 = vector.broadcast %cst_6 : f32 to vector<128x4xf32>
    %23 = arith.mulf %21, %22 : vector<128x4xf32>
    %24 = arith.truncf %23 : vector<128x4xf32> to vector<128x4xbf16>
    %c0_7 = arith.constant 0 : index
    %c0_8 = arith.constant 0 : index
    %25 = vector.load %arg4[%c0_7, %c0_8] : memref<4x128xbf16, #tpu.memory_space<vmem>>, vector<4x128xbf16>
    %cst_9 = arith.constant dense<0.000000e+00> : vector<128x128xf32>
    %26 = tpu.matmul %24, %25, %cst_9 {dimension_numbers = #tpu.dot_dimension_numbers<[1], [0], [0], [1], [0, 0, 1, 1], [], []>} : vector<128x4xbf16>, vector<4x128xbf16>, vector<128x128xf32> -> vector<128x128xf32>
    %c0_10 = arith.constant 0 : index
    %c0_11 = arith.constant 0 : index
    %27 = vector.load %arg5[%c0_10, %c0_11] : memref<128x128xf32, #tpu.memory_space<vmem>>, vector<128x128xf32>
    tpu.vector_store %arg5[%c0_10, %c0_11], %26 {strides = array<i32>} : memref<128x128xf32, #tpu.memory_space<vmem>>, vector<128x128xf32>,
    return
  }
  func.func @transform_0(%arg0: i32) -> (i32, i32, i32) {
    %c0_i32 = arith.constant 0 : i32
    %c0_i32_0 = arith.constant 0 : i32
    %c0_i32_1 = arith.constant 0 : i32
    return %c0_i32, %arg0, %c0_i32_0 : i32, i32, i32
  }
  func.func @transform_1(%arg0: i32) -> (i32, i32) {
    %c0_i32 = arith.constant 0 : i32
    %c0_i32_0 = arith.constant 0 : i32
    %c0_i32_1 = arith.constant 0 : i32
    return %c0_i32, %c0_i32_0 : i32, i32
  }
  func.func @transform_2(%arg0: i32) -> (i32, i32) {
    %c0_i32 = arith.constant 0 : i32
    %c0_i32_0 = arith.constant 0 : i32
    %c0_i32_1 = arith.constant 0 : i32
    return %c0_i32, %c0_i32_0 : i32, i32
  }
  func.func @transform_3(%arg0: i32) -> (i32, i32) {
    %c0_i32 = arith.constant 0 : i32
    %c0_i32_0 = arith.constant 0 : i32
    %c0_i32_1 = arith.constant 0 : i32
    return %c0_i32, %c0_i32_0 : i32, i32
  }
  func.func @transform_4(%arg0: i32) -> (i32, i32) {
    %c0_i32 = arith.constant 0 : i32
    %c0_i32_0 = arith.constant 0 : i32
    return %arg0, %c0_i32 : i32, i32
  }
}

</mosaic_0001>

<bundles_post_ra>
// kernel: tpu_custom_call.1
= control target key start
LH: loop header
LB: loop body
LE: loop exit
PB: predicated region body
PF: predicated region fallthrough
CT: control target
= control target key end

     0   :  { %vm387_vm0 = vcmask 1041408   ;;  %vm362_vm1 = vcmask 31744   ;;  %s958_s0 = inlined_call_operand.vmem [shape: f32[4,128,4], index: 0, kind: input, shape index: {}]   ;;  %s959_s1 = inlined_call_operand.vmem [shape: f32[1,4], index: 1, kind: input, shape index: {}]   ;;  %s960_s2 = inlined_call_operand.vmem [shape: f32[1,4], index: 2, kind: input, shape index: {}]   ;;  %s961_s3 = inlined_call_operand.vmem [shape: bf16[4,128], index: 3, kind: input, shape index: {}]   ;;  %s962_s4 = inlined_call_operand.hbm [shape: f32[128,128], index: 4, kind: output, shape index: {}]  }
   0x1   :  { %v361_v0 = vld [vmem:[%s961_s3] sm:$0x3]  ;;  %v22_v5 = vld [vmem:[%s958_s0 + $0x8] sm:$0xff] }
   0x2   :  { %v620_v1 = vld [vmem:[%s959_s1] ss:$0 sm:$0xff]  ;;  %559 = vmatprep.subr.msk.bf16.mxu0 %vm387_vm0, %v361_v0  ;;  %560 = vmatprep.subr.msk.bf16.mxu1 %vm387_vm0, %v361_v0  ;;  %v389_v3 = vsel %vm387_vm0, %v361_v0, 0  ;;  %v38_v8 = vld [vmem:[%s958_s0 + $0x88] sm:$0xff] }
   0x3   :  { %v21_v2 = vld [vmem:[%s958_s0] sm:$0xff]  ;;  %540 = vmatpush3.bf16.msra.mxu0 %v389_v3  ;;  %558 = vmatpush3.bf16.msra.mxu1 %v389_v3  ;;  %v54_v10 = vld [vmem:[%s958_s0 + $0x108] sm:$0xff]  ;;  %v92_v11 = vmul.f32 %v620_v1, %v22_v5  ;;  %v108_v15 = vmul.f32 %v620_v1, %v38_v8  ;;  %v23_v5 = vld [vmem:[%s958_s0 + $0x10] sm:$0xff] }
   0x4   :  { %v628_v4 = vld [vmem:[%s960_s2] ss:$0 sm:$0xff]  ;;  %v91_v7 = vmul.f32 %v620_v1, %v21_v2  ;;  %v70_v14 = vld [vmem:[%s958_s0 + $0x188] sm:$0xff]  ;;  %v124_v17 = vmul.f32 %v620_v1, %v54_v10 }
   0x5   :  { %v37_v6 = vld [vmem:[%s958_s0 + $0x80] sm:$0xff]  ;;  %v140_v20 = vmul.f32 %v620_v1, %v70_v14  ;;  %v162_v21 = vadd.f32 %v628_v4, %v92_v11  ;;  %v178_v24 = vadd.f32 %v628_v4, %v108_v15  ;;  %v30_v28 = vld [vmem:[%s958_s0 + $0x48] sm:$0xff]  ;;  %v39_v11 = vld [vmem:[%s958_s0 + $0x90] sm:$0xff] }
   0x6   :  { %v53_v9 = vld [vmem:[%s958_s0 + $0x100] sm:$0xff]  ;;  %v107_v12 = vmul.f32 %v620_v1, %v37_v6  ;;  %v161_v18 = vadd.f32 %v628_v4, %v91_v7  ;;  %v194_v26 = vadd.f32 %v628_v4, %v124_v17  ;;  %v46_v34 = vld [vmem:[%s958_s0 + $0xc8] sm:$0xff]  ;;  %v100_v46 = vmul.f32 %v620_v1, %v30_v28  ;;  %v24_v6 = vld [vmem:[%s958_s0 + $0x18] sm:$0xff] }
   0x7   :  { %v69_v13 = vld [vmem:[%s958_s0 + $0x180] sm:$0xff]  ;;  %v123_v16 = vmul.f32 %v620_v1, %v53_v9  ;;  %v210_v30 = vadd.f32 %v628_v4, %v140_v20  ;;  %v226_v31 = vmax.f32 %v162_v21, 0.0  ;;  %v242_v36 = vmax.f32 %v178_v24, 0.0  ;;  %v62_v39 = vld [vmem:[%s958_s0 + $0x148] sm:$0xff]  ;;  %v55_v17 = vld [vmem:[%s958_s0 + $0x110] sm:$0xff] }
   0x8   :  { %v139_v19 = vmul.f32 %v620_v1, %v69_v13  ;;  %v177_v22 = vadd.f32 %v628_v4, %v107_v12  ;;  %v29_v23 = vld [vmem:[%s958_s0 + $0x40] sm:$0xff]  ;;  %v225_v27 = vmax.f32 %v161_v18, 0.0  ;;  %v258_v38 = vmax.f32 %v194_v26, 0.0  ;;  %v78_v41 = vld [vmem:[%s958_s0 + $0x1c8] sm:$0xff]  ;;  %v40_v12 = vld [vmem:[%s958_s0 + $0x98] sm:$0xff] }
   0x9   :  { %v193_v25 = vadd.f32 %v628_v4, %v123_v16  ;;  %v45_v33 = vld [vmem:[%s958_s0 + $0xc0] sm:$0xff]  ;;  %v99_v42 = vmul.f32 %v620_v1, %v29_v23  ;;  %v274_v44 = vmax.f32 %v210_v30, 0.0  ;;  %v290_v47 = vadd.f32 %v242_v36, %v226_v31  ;;  %v56_v18 = vld [vmem:[%s958_s0 + $0x118] sm:$0xff] }
   0xa   :  { %v209_v29 = vadd.f32 %v628_v4, %v139_v19  ;;  %v241_v32 = vmax.f32 %v177_v22, 0.0  ;;  %v61_v35 = vld [vmem:[%s958_s0 + $0x140] sm:$0xff]  ;;  %v115_v48 = vmul.f32 %v620_v1, %v45_v33  ;;  %v116_v49 = vmul.f32 %v620_v1, %v46_v34  ;;  %v71_v22 = vld [vmem:[%s958_s0 + $0x190] sm:$0xff]  ;;  %v72_v23 = vld [vmem:[%s958_s0 + $0x198] sm:$0xff] }
   0xb   :  { %v257_v37 = vmax.f32 %v193_v25, 0.0  ;;  %v77_v40 = vld [vmem:[%s958_s0 + $0x1c0] sm:$0xff]  ;;  %v131_v50 = vmul.f32 %v620_v1, %v61_v35  ;;  %v132_v52 = vmul.f32 %v620_v1, %v62_v39  ;;  %v148_v54 = vmul.f32 %v620_v1, %v78_v41 }
   0xc   :  { %v273_v43 = vmax.f32 %v209_v29, 0.0  ;;  %v289_v45 = vadd.f32 %v241_v32, %v225_v27  ;;  %v147_v53 = vmul.f32 %v620_v1, %v77_v40  ;;  %v306_v55 = vadd.f32 %v290_v47, %v258_v38  ;;  %v47_v47 = vld [vmem:[%s958_s0 + $0xd0] sm:$0xff] }
   0xd   :  { %v169_v56 = vadd.f32 %v628_v4, %v99_v42  ;;  %v170_v57 = vadd.f32 %v628_v4, %v100_v46  ;;  %v185_v58 = vadd.f32 %v628_v4, %v115_v48  ;;  %v186_v60 = vadd.f32 %v628_v4, %v116_v49  ;;  %v32_v46 = vld [vmem:[%s958_s0 + $0x58] sm:$0xff] }
   0xe   :  { %v305_v51 = vadd.f32 %v289_v45, %v257_v37  ;;  %v201_v61 = vadd.f32 %v628_v4, %v131_v50  ;;  %v202_v62 = vadd.f32 %v628_v4, %v132_v52  ;;  %v322_v63 = vadd.f32 %v306_v55, %v274_v44  ;;  %v31_v45 = vld [vmem:[%s958_s0 + $0x50] sm:$0xff]  ;;  %v48_v52 = vld [vmem:[%s958_s0 + $0xd8] sm:$0xff] }
   0xf   :  { %v217_v0 = vadd.f32 %v628_v4, %v147_v53  ;;  %v218_v2 = vadd.f32 %v628_v4, %v148_v54  ;;  %v233_v3 = vmax.f32 %v169_v56, 0.0  ;;  %v234_v8 = vmax.f32 %v170_v57, 0.0  ;;  %v63_v53 = vld [vmem:[%s958_s0 + $0x150] sm:$0xff] }
  0x10   :  { %v321_v59 = vadd.f32 %v305_v51, %v273_v43  ;;  %v249_v9 = vmax.f32 %v185_v58, 0.0  ;;  %v250_v10 = vmax.f32 %v186_v60, 0.0  ;;  %v338_v13 = vmul.f32 0.25, %v322_v63  ;;  %v64_v58 = vld [vmem:[%s958_s0 + $0x158] sm:$0xff] }
  0x11   :  { %v265_v14 = vmax.f32 %v201_v61, 0.0  ;;  %v266_v15 = vmax.f32 %v202_v62, 0.0  ;;  %v281_v16 = vmax.f32 %v217_v0, 0.0  ;;  %v282_v19 = vmax.f32 %v218_v2, 0.0  ;;  %v80_v63 = vld [vmem:[%s958_s0 + $0x1d8] sm:$0xff] }
  0x12   :  { %v337_v7 = vmul.f32 0.25, %v321_v59  ;;  %v297_v20 = vadd.f32 %v249_v9, %v233_v3  ;;  %v298_v21 = vadd.f32 %v250_v10, %v234_v8  ;;  %v93_v24 = vmul.f32 %v620_v1, %v23_v5  ;;  %v79_v59 = vld [vmem:[%s958_s0 + $0x1d0] sm:$0xff] }
  0x13   :  { %v94_v26 = vmul.f32 %v620_v1, %v24_v6  ;;  %v109_v27 = vmul.f32 %v620_v1, %v39_v11  ;;  %v110_v28 = vmul.f32 %v620_v1, %v40_v12  ;;  %v125_v31 = vmul.f32 %v620_v1, %v55_v17 }
  0x14   :  { %v353_v25 = vpack.c.bf16 %v338_v13, %v337_v7  ;;  %v313_v29 = vadd.f32 %v297_v20, %v265_v14  ;;  %v314_v30 = vadd.f32 %v298_v21, %v266_v15  ;;  %v126_v32 = vmul.f32 %v620_v1, %v56_v18 }
  0x15   :  { %v141_v33 = vmul.f32 %v620_v1, %v71_v22  ;;  %v142_v34 = vmul.f32 %v620_v1, %v72_v23  ;;  %v163_v35 = vadd.f32 %v628_v4, %v93_v24  ;;  %v164_v36 = vadd.f32 %v628_v4, %v94_v26 }
  0x16   :  { %541 = vmatprep.mubr.msk.bf16.mxu0 %vm362_vm1, %v353_v25  ;;  %v329_v37 = vadd.f32 %v313_v29, %v281_v16  ;;  %v330_v38 = vadd.f32 %v314_v30, %v282_v19  ;;  %v179_v39 = vadd.f32 %v628_v4, %v109_v27  ;;  %v180_v40 = vadd.f32 %v628_v4, %v110_v28 }
  0x17   :  { %v195_v41 = vadd.f32 %v628_v4, %v125_v31  ;;  %v196_v42 = vadd.f32 %v628_v4, %v126_v32  ;;  %v211_v43 = vadd.f32 %v628_v4, %v141_v33  ;;  %v212_v44 = vadd.f32 %v628_v4, %v142_v34 }
  0x18   :  { %v345_v48 = vmul.f32 0.25, %v329_v37  ;;  %v346_v49 = vmul.f32 0.25, %v330_v38  ;;  %v227_v50 = vmax.f32 %v163_v35, 0.0  ;;  %v228_v51 = vmax.f32 %v164_v36, 0.0 }
  0x19   :  { %v243_v54 = vmax.f32 %v179_v39, 0.0  ;;  %v244_v55 = vmax.f32 %v180_v40, 0.0  ;;  %v259_v56 = vmax.f32 %v195_v41, 0.0  ;;  %v260_v57 = vmax.f32 %v196_v42, 0.0 }
  0x1a   :  { %v357_v60 = vpack.c.bf16 %v346_v49, %v345_v48  ;;  %v275_v61 = vmax.f32 %v211_v43, 0.0  ;;  %v276_v62 = vmax.f32 %v212_v44, 0.0  ;;  %v101_v0 = vmul.f32 %v620_v1, %v31_v45 }
  0x1b   :  { %9 = vsyncpa [#allocation3], 0  ;;  %v291_v2 = vadd.f32 %v243_v54, %v227_v50  ;;  %v292_v3 = vadd.f32 %v244_v55, %v228_v51  ;;  %v102_v5 = vmul.f32 %v620_v1, %v32_v46  ;;  %v117_v6 = vmul.f32 %v620_v1, %v47_v47  ;;  %v25_v27 = vld [vmem:[%s958_s0 + $0x20] sm:$0xff]  ;;  %v26_v28 = vld [vmem:[%s958_s0 + $0x28] sm:$0xff] }
  0x1c   :  { %549 = vmatprep.mubr.msk.bf16.mxu1 %vm362_vm1, %v357_v60  ;;  %v118_v7 = vmul.f32 %v620_v1, %v48_v52  ;;  %v133_v8 = vmul.f32 %v620_v1, %v63_v53  ;;  %v134_v9 = vmul.f32 %v620_v1, %v64_v58  ;;  %v149_v10 = vmul.f32 %v620_v1, %v79_v59  ;;  %v41_v29 = vld [vmem:[%s958_s0 + $0xa0] sm:$0xff]  ;;  %v42_v34 = vld [vmem:[%s958_s0 + $0xa8] sm:$0xff] }
  0x1d   :  { %v307_v11 = vadd.f32 %v291_v2, %v259_v56  ;;  %v308_v12 = vadd.f32 %v292_v3, %v260_v57  ;;  %v150_v13 = vmul.f32 %v620_v1, %v80_v63  ;;  %v171_v14 = vadd.f32 %v628_v4, %v101_v0  ;;  %v57_v35 = vld [vmem:[%s958_s0 + $0x120] sm:$0xff]  ;;  %v58_v40 = vld [vmem:[%s958_s0 + $0x128] sm:$0xff] }
  0x1e   :  { %v172_v15 = vadd.f32 %v628_v4, %v102_v5  ;;  %v187_v16 = vadd.f32 %v628_v4, %v117_v6  ;;  %v188_v17 = vadd.f32 %v628_v4, %v118_v7  ;;  %v203_v18 = vadd.f32 %v628_v4, %v133_v8  ;;  %v73_v41 = vld [vmem:[%s958_s0 + $0x1a0] sm:$0xff]  ;;  %v74_v42 = vld [vmem:[%s958_s0 + $0x1a8] sm:$0xff] }
  0x1f   :  { %v323_v19 = vadd.f32 %v307_v11, %v275_v61  ;;  %v324_v20 = vadd.f32 %v308_v12, %v276_v62  ;;  %v204_v21 = vadd.f32 %v628_v4, %v134_v9  ;;  %v219_v22 = vadd.f32 %v628_v4, %v149_v10  ;;  %v33_v5 = vld [vmem:[%s958_s0 + $0x60] sm:$0xff]  ;;  %v34_v6 = vld [vmem:[%s958_s0 + $0x68] sm:$0xff] }
  0x20   :  { %v220_v23 = vadd.f32 %v628_v4, %v150_v13  ;;  %v235_v24 = vmax.f32 %v171_v14, 0.0  ;;  %v236_v25 = vmax.f32 %v172_v15, 0.0  ;;  %v251_v26 = vmax.f32 %v187_v16, 0.0  ;;  %v49_v7 = vld [vmem:[%s958_s0 + $0xe0] sm:$0xff]  ;;  %v50_v12 = vld [vmem:[%s958_s0 + $0xe8] sm:$0xff] }
  0x21   :  { %v339_v30 = vmul.f32 0.25, %v323_v19  ;;  %v340_v31 = vmul.f32 0.25, %v324_v20  ;;  %v252_v32 = vmax.f32 %v188_v17, 0.0  ;;  %v267_v33 = vmax.f32 %v203_v18, 0.0  ;;  %v65_v13 = vld [vmem:[%s958_s0 + $0x160] sm:$0xff]  ;;  %v66_v18 = vld [vmem:[%s958_s0 + $0x168] sm:$0xff] }
  0x22   :  { %v268_v36 = vmax.f32 %v204_v21, 0.0  ;;  %v283_v37 = vmax.f32 %v219_v22, 0.0  ;;  %v284_v38 = vmax.f32 %v220_v23, 0.0  ;;  %v299_v39 = vadd.f32 %v251_v26, %v235_v24  ;;  %v81_v19 = vld [vmem:[%s958_s0 + $0x1e0] sm:$0xff]  ;;  %v82_v23 = vld [vmem:[%s958_s0 + $0x1e8] sm:$0xff] }
  0x23   :  { %v354_v43 = vpack.c.bf16 %v340_v31, %v339_v30  ;;  %v300_v44 = vadd.f32 %v252_v32, %v236_v25  ;;  %v95_v45 = vmul.f32 %v620_v1, %v25_v27  ;;  %v96_v46 = vmul.f32 %v620_v1, %v26_v28 }
  0x24   :  { %v315_v47 = vadd.f32 %v299_v39, %v267_v33  ;;  %v111_v48 = vmul.f32 %v620_v1, %v41_v29  ;;  %v112_v49 = vmul.f32 %v620_v1, %v42_v34  ;;  %v127_v50 = vmul.f32 %v620_v1, %v57_v35 }
  0x25   :  { %542 = vmatmul.mubr.msk.bf16.vlgmr.msra.gmra.mxu0 %vm362_vm1, %v354_v43  ;;  %v316_v51 = vadd.f32 %v300_v44, %v268_v36  ;;  %v128_v52 = vmul.f32 %v620_v1, %v58_v40  ;;  %v143_v53 = vmul.f32 %v620_v1, %v73_v41  ;;  %v144_v54 = vmul.f32 %v620_v1, %v74_v42 }
  0x26   :  { %v331_v55 = vadd.f32 %v315_v47, %v283_v37  ;;  %v165_v56 = vadd.f32 %v628_v4, %v95_v45  ;;  %v166_v57 = vadd.f32 %v628_v4, %v96_v46  ;;  %v181_v58 = vadd.f32 %v628_v4, %v111_v48  ;;  %v27_v45 = vld [vmem:[%s958_s0 + $0x30] sm:$0xff]  ;;  %v28_v46 = vld [vmem:[%s958_s0 + $0x38] sm:$0xff] }
  0x27   :  { %v332_v59 = vadd.f32 %v316_v51, %v284_v38  ;;  %v182_v60 = vadd.f32 %v628_v4, %v112_v49  ;;  %v197_v61 = vadd.f32 %v628_v4, %v127_v50  ;;  %v198_v62 = vadd.f32 %v628_v4, %v128_v52  ;;  %v43_v47 = vld [vmem:[%s958_s0 + $0xb0] sm:$0xff]  ;;  %v44_v52 = vld [vmem:[%s958_s0 + $0xb8] sm:$0xff] }
  0x28   :  { %v347_v63 = vmul.f32 0.25, %v331_v55  ;;  %v213_v0 = vadd.f32 %v628_v4, %v143_v53  ;;  %v214_v2 = vadd.f32 %v628_v4, %v144_v54  ;;  %v229_v3 = vmax.f32 %v165_v56, 0.0  ;;  %v59_v53 = vld [vmem:[%s958_s0 + $0x130] sm:$0xff] }
  0x29   :  { %v348_v8 = vmul.f32 0.25, %v332_v59  ;;  %v230_v9 = vmax.f32 %v166_v57, 0.0  ;;  %v245_v10 = vmax.f32 %v181_v58, 0.0  ;;  %v246_v11 = vmax.f32 %v182_v60, 0.0  ;;  %v60_v58 = vld [vmem:[%s958_s0 + $0x138] sm:$0xff]  ;;  %v75_v59 = vld [vmem:[%s958_s0 + $0x1b0] sm:$0xff] }
  0x2a   :  { %v261_v14 = vmax.f32 %v197_v61, 0.0  ;;  %v262_v15 = vmax.f32 %v198_v62, 0.0  ;;  %v277_v16 = vmax.f32 %v213_v0, 0.0  ;;  %v278_v17 = vmax.f32 %v214_v2, 0.0 }
  0x2b   :  { %v358_v20 = vpack.c.bf16 %v348_v8, %v347_v63  ;;  %v293_v21 = vadd.f32 %v245_v10, %v229_v3  ;;  %v294_v22 = vadd.f32 %v246_v11, %v230_v9  ;;  %v103_v24 = vmul.f32 %v620_v1, %v33_v5  ;;  %v76_v63 = vld [vmem:[%s958_s0 + $0x1b8] sm:$0xff] }
  0x2c   :  { %v104_v25 = vmul.f32 %v620_v1, %v34_v6  ;;  %v119_v26 = vmul.f32 %v620_v1, %v49_v7  ;;  %v120_v27 = vmul.f32 %v620_v1, %v50_v12  ;;  %v135_v28 = vmul.f32 %v620_v1, %v65_v13 }
  0x2d   :  { %550 = vmatmul.mubr.msk.bf16.vlgmr.msra.gmra.mxu1 %vm362_vm1, %v358_v20  ;;  %v309_v29 = vadd.f32 %v293_v21, %v261_v14  ;;  %v310_v30 = vadd.f32 %v294_v22, %v262_v15  ;;  %v136_v31 = vmul.f32 %v620_v1, %v66_v18  ;;  %v151_v32 = vmul.f32 %v620_v1, %v81_v19 }
  0x2e   :  { %v152_v33 = vmul.f32 %v620_v1, %v82_v23  ;;  %v173_v34 = vadd.f32 %v628_v4, %v103_v24  ;;  %v174_v35 = vadd.f32 %v628_v4, %v104_v25  ;;  %v189_v36 = vadd.f32 %v628_v4, %v119_v26  ;;  %v35_v23 = vld [vmem:[%s958_s0 + $0x70] sm:$0xff]  ;;  %v36_v24 = vld [vmem:[%s958_s0 + $0x78] sm:$0xff] }
  0x2f   :  { %v325_v37 = vadd.f32 %v309_v29, %v277_v16  ;;  %v326_v38 = vadd.f32 %v310_v30, %v278_v17  ;;  %v190_v39 = vadd.f32 %v628_v4, %v120_v27  ;;  %v205_v40 = vadd.f32 %v628_v4, %v135_v28  ;;  %v51_v29 = vld [vmem:[%s958_s0 + $0xf0] sm:$0xff]  ;;  %v52_v30 = vld [vmem:[%s958_s0 + $0xf8] sm:$0xff] }
  0x30   :  { %v206_v41 = vadd.f32 %v628_v4, %v136_v31  ;;  %v221_v42 = vadd.f32 %v628_v4, %v151_v32  ;;  %v222_v43 = vadd.f32 %v628_v4, %v152_v33  ;;  %v237_v44 = vmax.f32 %v173_v34, 0.0 }
  0x31   :  { %v341_v48 = vmul.f32 0.25, %v325_v37  ;;  %v342_v49 = vmul.f32 0.25, %v326_v38  ;;  %v238_v50 = vmax.f32 %v174_v35, 0.0  ;;  %v253_v51 = vmax.f32 %v189_v36, 0.0  ;;  %v67_v35 = vld [vmem:[%s958_s0 + $0x170] sm:$0xff]  ;;  %v68_v36 = vld [vmem:[%s958_s0 + $0x178] sm:$0xff] }
  0x32   :  { %v254_v54 = vmax.f32 %v190_v39, 0.0  ;;  %v269_v55 = vmax.f32 %v205_v40, 0.0  ;;  %v270_v56 = vmax.f32 %v206_v41, 0.0  ;;  %v285_v57 = vmax.f32 %v221_v42, 0.0  ;;  %v83_v40 = vld [vmem:[%s958_s0 + $0x1f0] sm:$0xff]  ;;  %v84_v41 = vld [vmem:[%s958_s0 + $0x1f8] sm:$0xff] }
  0x33   :  { %v355_v60 = vpack.c.bf16 %v342_v49, %v341_v48  ;;  %v286_v61 = vmax.f32 %v222_v43, 0.0  ;;  %v301_v62 = vadd.f32 %v253_v51, %v237_v44  ;;  %v97_v0 = vmul.f32 %v620_v1, %v27_v45  ;;  %s586_s0 = smov [#allocation2]  }
  0x34   :  { %v302_v2 = vadd.f32 %v254_v54, %v238_v50  ;;  %v98_v3 = vmul.f32 %v620_v1, %v28_v46  ;;  %v113_v5 = vmul.f32 %v620_v1, %v43_v47  ;;  %v114_v6 = vmul.f32 %v620_v1, %v44_v52  ;;  %s509_s30 = sshll.u32 %s586_s0, 4  ;;  %s510_s30 = int_to_ptr.vmem [resolvable:$true] %s509_s30 }
  0x35   :  { %545 = vmatprep.mubr.msk.bf16.mxu0 %vm362_vm1, %v355_v60  ;;  %v317_v7 = vadd.f32 %v301_v62, %v269_v55  ;;  %v129_v8 = vmul.f32 %v620_v1, %v59_v53  ;;  %v130_v9 = vmul.f32 %v620_v1, %v60_v58  ;;  %v145_v10 = vmul.f32 %v620_v1, %v75_v59  ;;  %s564_s5 = scalar_lea.vmem %s510_s30, 2048  ;;  %p569_p1 = scmp.lt.s32.totalorder %s510_s30, %s510_s30 }
  0x36   :  { %v318_v11 = vadd.f32 %v302_v2, %v270_v56  ;;  %v146_v12 = vmul.f32 %v620_v1, %v76_v63  ;;  %v167_v13 = vadd.f32 %v628_v4, %v97_v0  ;;  %v168_v14 = vadd.f32 %v628_v4, %v98_v3  ;;  %p565_p0 = scmp.ne.s32.totalorder %s510_s30, %s564_s5  ;;  %p570_p2 = scmp.lt.s32.totalorder %s564_s5, %s564_s5 }
  0x37   :  { %v333_v15 = vadd.f32 %v317_v7, %v285_v57  ;;  %v183_v16 = vadd.f32 %v628_v4, %v113_v5  ;;  %v184_v17 = vadd.f32 %v628_v4, %v114_v6  ;;  %v199_v18 = vadd.f32 %v628_v4, %v129_v8 }
  0x38   :  { %v334_v19 = vadd.f32 %v318_v11, %v286_v61  ;;  %v200_v20 = vadd.f32 %v628_v4, %v130_v9  ;;  %v215_v21 = vadd.f32 %v628_v4, %v145_v10  ;;  %v216_v22 = vadd.f32 %v628_v4, %v146_v12  ;;  %p571_p3 = por %p570_p2, %p569_p1 }
  0x39   :  { %v349_v25 = vmul.f32 0.25, %v333_v15  ;;  %v231_v26 = vmax.f32 %v167_v13, 0.0  ;;  %v232_v27 = vmax.f32 %v168_v14, 0.0  ;;  %v247_v28 = vmax.f32 %v183_v16, 0.0 }
  0x3a   :  { %v350_v31 = vmul.f32 0.25, %v334_v19  ;;  %v248_v32 = vmax.f32 %v184_v17, 0.0  ;;  %v263_v33 = vmax.f32 %v199_v18, 0.0  ;;  %v264_v34 = vmax.f32 %v200_v20, 0.0  ;;  %p572_p4 = pnand %p571_p3, %p565_p0 }
  0x3b   :  { %v279_v37 = vmax.f32 %v215_v21, 0.0  ;;  %v280_v38 = vmax.f32 %v216_v22, 0.0  ;;  %v295_v39 = vadd.f32 %v247_v28, %v231_v26  ;;  %v105_v42 = vmul.f32 %v620_v1, %v35_v23 }
  0x3c   :  { %v359_v43 = vpack.c.bf16 %v350_v31, %v349_v25  ;;  %v296_v44 = vadd.f32 %v248_v32, %v232_v27  ;;  %v106_v45 = vmul.f32 %v620_v1, %v36_v24  ;;  %v121_v46 = vmul.f32 %v620_v1, %v51_v29 }
  0x3d   :  { %v311_v47 = vadd.f32 %v295_v39, %v263_v33  ;;  %v122_v48 = vmul.f32 %v620_v1, %v52_v30  ;;  %v137_v49 = vmul.f32 %v620_v1, %v67_v35  ;;  %v138_v50 = vmul.f32 %v620_v1, %v68_v36 }
  0x3e   :  { %553 = vmatprep.mubr.msk.bf16.mxu1 %vm362_vm1, %v359_v43  ;;  %v312_v51 = vadd.f32 %v296_v44, %v264_v34  ;;  %v153_v52 = vmul.f32 %v620_v1, %v83_v40  ;;  %v154_v53 = vmul.f32 %v620_v1, %v84_v41  ;;  %v175_v54 = vadd.f32 %v628_v4, %v105_v42 }
  0x3f   :  { %v327_v55 = vadd.f32 %v311_v47, %v279_v37  ;;  %v176_v56 = vadd.f32 %v628_v4, %v106_v45  ;;  %v191_v57 = vadd.f32 %v628_v4, %v121_v46  ;;  %v192_v58 = vadd.f32 %v628_v4, %v122_v48 }
  0x40   :  { %v328_v59 = vadd.f32 %v312_v51, %v280_v38  ;;  %v207_v60 = vadd.f32 %v628_v4, %v137_v49  ;;  %v208_v61 = vadd.f32 %v628_v4, %v138_v50  ;;  %v223_v62 = vadd.f32 %v628_v4, %v153_v52 }
  0x41   :  { %v343_v63 = vmul.f32 0.25, %v327_v55  ;;  %v224_v0 = vadd.f32 %v628_v4, %v154_v53  ;;  %v239_v1 = vmax.f32 %v175_v54, 0.0  ;;  %v240_v2 = vmax.f32 %v176_v56, 0.0 }
  0x42   :  { %v344_v3 = vmul.f32 0.25, %v328_v59  ;;  %v255_v5 = vmax.f32 %v191_v57, 0.0  ;;  %v256_v6 = vmax.f32 %v192_v58, 0.0  ;;  %v271_v7 = vmax.f32 %v207_v60, 0.0 }
  0x43   :  { %v272_v8 = vmax.f32 %v208_v61, 0.0  ;;  %v287_v9 = vmax.f32 %v223_v62, 0.0  ;;  %v288_v11 = vmax.f32 %v224_v0, 0.0 }
  0x44   :  { %v356_v10 = vpack.c.bf16 %v344_v3, %v343_v63  ;;  %v303_v12 = vadd.f32 %v255_v5, %v239_v1  ;;  %v304_v13 = vadd.f32 %v256_v6, %v240_v2 }
  0x46   :  { %546 = vmatmul.mubr.msk.bf16.gmra.mxu0 %vm362_vm1, %v356_v10  ;;  %v319_v14 = vadd.f32 %v303_v12, %v271_v7  ;;  %v320_v15 = vadd.f32 %v304_v13, %v272_v8 }
  0x48   :  { %v335_v16 = vadd.f32 %v319_v14, %v287_v9  ;;  %v336_v17 = vadd.f32 %v320_v15, %v288_v11 }
  0x4a   :  { %v351_v18 = vmul.f32 0.25, %v335_v16  ;;  %v352_v4 = vmul.f32 0.25, %v336_v17 }
  0x4c   :  { %v360_v19 = vpack.c.bf16 %v352_v4, %v351_v18 }
  0x4e   :  { %554 = vmatmul.mubr.msk.bf16.gmra.mxu1 %vm362_vm1, %v360_v19 }
  0xe5   :  { %v543_v20 = vpop.f32.mrf.mxu0 }
  0xe6   :  { %490 = vst [vmem:[#allocation2 + $0x10] sm:$0xff] %v543_v20 }
  0xe7   :  { %v425_v21 = vpop.f32.mrf.mxu0 }
  0xe8   :  { %488 = vst [vmem:[#allocation2] sm:$0xff] %v425_v21 }
  0xe9   :  { %v544_v22 = vpop.f32.mrf.mxu0 }
  0xea   :  { %491 = vst [vmem:[#allocation2 + $0x18] sm:$0xff] %v544_v22 }
  0xeb   :  { %v428_v23 = vpop.f32.mrf.mxu0 }
  0xec   :  { %489 = vst [vmem:[#allocation2 + $0x8] sm:$0xff] %v428_v23 }
  0xed   :  { %v551_v24 = vpop.f32.mrf.mxu1 }
  0xee   :  { %498 = vst [vmem:[#allocation2 + $0x50] sm:$0xff] %v551_v24 }
  0xef   :  { %v457_v25 = vpop.f32.mrf.mxu1 }
  0xf0   :  { %496 = vst [vmem:[#allocation2 + $0x40] sm:$0xff] %v457_v25 }
  0xf1   :  { %v552_v26 = vpop.f32.mrf.mxu1 }
  0xf2   :  { %499 = vst [vmem:[#allocation2 + $0x58] sm:$0xff] %v552_v26 }
  0xf3   :  { %v460_v27 = vpop.f32.mrf.mxu1 }
  0xf4   :  { %497 = vst [vmem:[#allocation2 + $0x48] sm:$0xff] %v460_v27 }
 0x106   :  { %v547_v28 = vpop.f32.mrf.mxu0 }
 0x107   :  { %494 = vst [vmem:[#allocation2 + $0x30] sm:$0xff] %v547_v28 }
 0x108   :  { %v441_v29 = vpop.f32.mrf.mxu0 }
 0x109   :  { %492 = vst [vmem:[#allocation2 + $0x20] sm:$0xff] %v441_v29 }
 0x10a   :  { %v548_v30 = vpop.f32.mrf.mxu0 }
 0x10b   :  { %495 = vst [vmem:[#allocation2 + $0x38] sm:$0xff] %v548_v30 }
 0x10c   :  { %v444_v31 = vpop.f32.mrf.mxu0 }
 0x10d   :  { %493 = vst [vmem:[#allocation2 + $0x28] sm:$0xff] %v444_v31 }
 0x10e   :  { %v555_v32 = vpop.f32.mrf.mxu1 }
 0x10f   :  { %502 = vst [vmem:[#allocation2 + $0x70] sm:$0xff] %v555_v32 }
 0x110   :  { %v473_v33 = vpop.f32.mrf.mxu1 }
 0x111   :  { %500 = vst [vmem:[#allocation2 + $0x60] sm:$0xff] %v473_v33 }
 0x112   :  { %v556_v34 = vpop.f32.mrf.mxu1 }
 0x113   :  { %503 = vst [vmem:[#allocation2 + $0x78] sm:$0xff] %v556_v34 }
 0x114   :  { %v476_v35 = vpop.f32.mrf.mxu1 }
 0x115   :  { %501 = vst [vmem:[#allocation2 + $0x68] sm:$0xff] %v476_v35 }
 0x116   :  { %575 = shalt.err (!%p572_p4)
}
 0x117   :  { %s587_s6 = smov 128   ;;  %s588_s7 = smov 8  }
 0x118   :  { %515 = dma.vmem_to_hbm [thread:$0]  %s510_s30, 2048, %s962_s4, [#allocation3], %s587_s6, %s587_s6, %s588_s7  }
 0x119   :  { %584 = dma.done.wait [#allocation3], 2048  }
 0x11a   :  { %585 = vsyncadd [#allocation3], 4294965248 }
 0x11b   :  { %519 = vsyncpa [#allocation3], 1 }

</bundles_post_ra>
